<compile_context>
chip_gen: v7x
topology: tpu7x:2x2x1
jax: 0.10.0
libtpu: 0.0.40
codegen_flags: <defaults>
</compile_context>

<pallas_src>
import functools

import jax
import jax.numpy as jnp
from jax.experimental import pallas as pl
from jax.experimental.pallas import tpu as pltpu


def _dropout_encoder_kernel(u_ref, x_ref, o_ref, *, p):
    """Zero feature columns of the current batch tile where u <= p."""
    drop = u_ref[...] <= jnp.float32(p)          # (1, F) mask, broadcasts over rows
    x = x_ref[...]                               # (TB, F) tile
    o_ref[...] = jnp.where(drop, jnp.zeros_like(x), x)


def dropout_encoder(x, p, seed, *, training=True,
                    vmem_tile_budget_bytes=8 * 1024 * 1024):
    """JAX wrapper mirroring DropoutEncoder.forward.

    x: (batch, features) array
    p: python float, drop probability threshold
    seed: int seed for the per-feature uniform draw
    """
    if not training:
        return x

    b, f = x.shape

    # One uniform(0,1) draw per feature column (same mask for every row).
    u = jax.random.uniform(jax.random.PRNGKey(seed), (1, f), dtype=jnp.float32)

    # Batch-tile sizing: double-buffered input + output ~= 4 * TB * F * itemsize.
    itemsize = jnp.dtype(x.dtype).itemsize
    max_rows = max(8, (vmem_tile_budget_bytes // (4 * f * itemsize)) // 8 * 8)
    tb = b if b <= max_rows else int(max_rows)
    grid = (pl.cdiv(b, tb),)

    kernel = functools.partial(_dropout_encoder_kernel, p=float(p))
    return pl.pallas_call(
        kernel,
        out_shape=jax.ShapeDtypeStruct((b, f), x.dtype),
        grid=grid,
        in_specs=[
            # Per-feature uniforms: same tiny block at every grid step.
            pl.BlockSpec((1, f), lambda i: (0, 0)),
            # Batch tile of x.
            pl.BlockSpec((tb, f), lambda i: (i, 0)),
        ],
        out_specs=pl.BlockSpec((tb, f), lambda i: (i, 0)),
        compiler_params=pltpu.CompilerParams(
            dimension_semantics=("parallel",),
        ),
    )(u, x)


def _check(x, out, u, p):
    x_np = jax.device_get(x)
    out_np = jax.device_get(out)
    u_np = jax.device_get(u)

    # Reference: masked_fill along feature columns.
    expected = jax.device_get(jnp.where(u <= p, jnp.zeros_like(x), x))
    assert (out_np == expected).all(), "kernel output mismatch vs reference"

    # Each feature column is either untouched or fully zeroed.
    col_zero = (out_np == 0.0).all(axis=0)
    col_keep = (out_np == x_np).all(axis=0)
    assert bool((col_zero | col_keep).all()), "mask must act per-feature column"


if __name__ == "__main__":
    key = jax.random.PRNGKey(0)
    p = 0.5
    seed = 1234

    # Small, lane-dense example shape.
    batch, features = 16, 128
    x = jax.random.normal(key, (batch, features), dtype=jnp.float32)
    u = jax.random.uniform(jax.random.PRNGKey(seed), (1, features), dtype=jnp.float32)

    out = jax.block_until_ready(dropout_encoder(x, p, seed, training=True))
    _check(x, out, u, p)

    # Exercise the batch-tiled (multi-grid-step) path with a tiny VMEM budget.
    batch2, features2 = 48, 128
    x2 = jax.random.normal(jax.random.PRNGKey(1), (batch2, features2), dtype=jnp.float32)
    u2 = jax.random.uniform(jax.random.PRNGKey(seed), (1, features2), dtype=jnp.float32)
    out2 = jax.block_until_ready(
        dropout_encoder(x2, p, seed, training=True,
                        vmem_tile_budget_bytes=4 * 16 * features2 * 4))  # -> TB=16, grid=3
    _check(x2, out2, u2, p)

    # Non-128-multiple feature dim (full-extent last block dim).
    batch3, features3 = 2, 32
    x3 = jax.random.normal(jax.random.PRNGKey(2), (batch3, features3), dtype=jnp.float32)
    u3 = jax.random.uniform(jax.random.PRNGKey(seed), (1, features3), dtype=jnp.float32)
    out3 = jax.block_until_ready(dropout_encoder(x3, p, seed, training=True))
    _check(x3, out3, u3, p)

    # Eval mode must be identity.
    out_eval = jax.block_until_ready(dropout_encoder(x, p, seed, training=False))
    assert bool((jax.device_get(out_eval) == jax.device_get(x)).all())

    print("KERNEL_OK")
</pallas_src>

<mosaic_0001>
module attributes {stable_mosaic.version = 11 : i64} {
  func.func @_dropout_encoder_kernel(%arg0: i32, %arg1: memref<1x128xf32, #tpu.memory_space<vmem>>, %arg2: memref<16x128xf32, #tpu.memory_space<vmem>>, %arg3: memref<16x128xf32, #tpu.memory_space<vmem>>) attributes {dimension_semantics = [#tpu.dimension_semantics<parallel>], iteration_bounds = array<i64: 1>, scalar_prefetch = 0 : i64, scratch_operands = 0 : i64, tpu.core_type = #tpu.core_type<tc>, window_params = [{pipeline_mode = #tpu.pipeline_mode<synchronous>, transform_indices = @transform_0, window_bounds = array<i64: 1, 128>}, {transform_indices = @transform_1, window_bounds = array<i64: 16, 128>}, {transform_indices = @transform_2, window_bounds = array<i64: 16, 128>}]} {
    %c0 = arith.constant 0 : index
    %c0_0 = arith.constant 0 : index
    %0 = vector.load %arg1[%c0, %c0_0] : memref<1x128xf32, #tpu.memory_space<vmem>>, vector<1x128xf32>
    %cst = arith.constant 5.000000e-01 : f32
    %1 = vector.broadcast %cst : f32 to vector<1x128xf32>
    %2 = arith.cmpf ole, %0, %1 : vector<1x128xf32>
    %c0_1 = arith.constant 0 : index
    %c0_2 = arith.constant 0 : index
    %3 = vector.load %arg2[%c0_1, %c0_2] : memref<16x128xf32, #tpu.memory_space<vmem>>, vector<16x128xf32>
    %cst_3 = arith.constant 0.000000e+00 : f32
    %4 = vector.broadcast %cst_3 : f32 to vector<16x128xf32>
    %5 = vector.shape_cast %2 : vector<1x128xi1> to vector<1x128xi1>
    %6 = vector.broadcast %5 : vector<1x128xi1> to vector<16x128xi1>
    %7 = arith.select %6, %4, %3 : vector<16x128xi1>, vector<16x128xf32>
    %c0_4 = arith.constant 0 : index
    %c0_5 = arith.constant 0 : index
    %8 = vector.load %arg3[%c0_4, %c0_5] : memref<16x128xf32, #tpu.memory_space<vmem>>, vector<16x128xf32>
    tpu.vector_store %arg3[%c0_4, %c0_5], %7 {strides = array<i32>} : memref<16x128xf32, #tpu.memory_space<vmem>>, vector<16x128xf32>,
    return
  }
  func.func @transform_0(%arg0: i32) -> (i32, i32) {
    %c0_i32 = arith.constant 0 : i32
    %c0_i32_0 = arith.constant 0 : i32
    %c0_i32_1 = arith.constant 0 : i32
    return %c0_i32, %c0_i32_0 : i32, i32
  }
  func.func @transform_1(%arg0: i32) -> (i32, i32) {
    %c0_i32 = arith.constant 0 : i32
    %c0_i32_0 = arith.constant 0 : i32
    return %arg0, %c0_i32 : i32, i32
  }
  func.func @transform_2(%arg0: i32) -> (i32, i32) {
    %c0_i32 = arith.constant 0 : i32
    %c0_i32_0 = arith.constant 0 : i32
    return %arg0, %c0_i32 : i32, i32
  }
}

</mosaic_0001>

<bundles_post_ra>
// kernel: tpu_custom_call.1
= control target key start
LH: loop header
LB: loop body
LE: loop exit
PB: predicated region body
PF: predicated region fallthrough
CT: control target
= control target key end

     0   :  { %7 = vsyncpa [#allocation3], 0  ;;  %s218_s0 = inlined_call_operand.hbm [shape: f32[1,128], index: 0, kind: input, shape index: {}]   ;;  %s219_s1 = inlined_call_operand.hbm [shape: f32[16,128], index: 1, kind: input, shape index: {}]   ;;  %s220_s2 = inlined_call_operand.hbm [shape: f32[16,128], index: 2, kind: output, shape index: {}]  }
   0x1   :  { %8 = vsyncpa [#allocation6], 0 }
   0x2   :  { %9 = vsyncpa [#allocation4], 0  ;;  %s148_s9 = smov [#allocation2]   ;;  %s149_s11 = smov [#allocation5]  }
   0x3   :  { %s16_s10 = sshll.u32 %s148_s9, 4  ;;  %s25_s12 = sshll.u32 %s149_s11, 4  ;;  %s17_s10 = int_to_ptr.vmem [resolvable:$true] %s16_s10  ;;  %s169_s12 = int_to_ptr.vmem [resolvable:$true] %s25_s12 }
   0x4   :  { %s76_s15 = scalar_lea.hbm %s218_s0, 16 }
   0x5   :  { %p77_p0 = scmp.ne.s32.totalorder %s218_s0, %s76_s15  ;;  %p80_p1 = scmp.lt.u32.totalorder %s76_s15, %s218_s0 }
   0x7   :  { %p82_p2 = pnand %p80_p1, %p77_p0 }
   0x9   :  { %85 = shalt.err (!%p82_p2)
}
   0xa   :  { %s86_s20 = scalar_lea.vmem %s17_s10, 16  ;;  %s90_s21 = scalar_lea.vmem %s17_s10, 32 }
   0xb   :  { %p87_p3 = scmp.ne.s32.totalorder %s17_s10, %s86_s20  ;;  %p91_p4 = scmp.lt.s32.totalorder %s17_s10, %s17_s10 }
   0xc   :  { %p92_p5 = scmp.lt.s32.totalorder %s90_s21, %s86_s20 }
   0xe   :  { %p93_p6 = por %p92_p5, %p91_p4 }
  0x10   :  { %p94_p7 = pnand %p93_p6, %p87_p3 }
  0x12   :  { %97 = shalt.err (!%p94_p7)
}
  0x13   :  { %19 = dma.hbm_to_vmem [thread:$0]  %s218_s0, 16, %s17_s10, [#allocation3]  }
  0x14   :  { %s98_s26 = scalar_lea.hbm %s219_s1, 256 }
  0x15   :  { %p99_p8 = scmp.ne.s32.totalorder %s219_s1, %s98_s26  ;;  %p102_p9 = scmp.lt.u32.totalorder %s98_s26, %s219_s1 }
  0x17   :  { %p104_p10 = pnand %p102_p9, %p99_p8 }
  0x19   :  { %107 = shalt.err (!%p104_p10)
}
  0x1a   :  { %s108_s3 = scalar_lea.vmem %s169_s12, 256  ;;  %p113_p12 = scmp.lt.s32.totalorder %s169_s12, %s169_s12 }
  0x1b   :  { %p109_p11 = scmp.ne.s32.totalorder %s169_s12, %s108_s3  ;;  %p114_p13 = scmp.lt.s32.totalorder %s108_s3, %s108_s3 }
  0x1d   :  { %p115_p0 = por %p114_p13, %p113_p12 }
  0x1f   :  { %p116_p1 = pnand %p115_p0, %p109_p11 }
  0x21   :  { %119 = shalt.err (!%p116_p1)
}
  0x22   :  { %s150_s0 = smov 128   ;;  %s151_s4 = smov 8  }
  0x23   :  { %31 = dma.hbm_to_vmem [thread:$0]  %s219_s1, 256, %s169_s12, [#allocation6], %s150_s0, %s150_s0, %s151_s4  }
  0x24   :  { %142 = dma.done.wait [#allocation3], 16  }
  0x25   :  { %143 = vsyncadd [#allocation3], 4294967280 }
  0x26   :  { %144 = dma.done.wait [#allocation6], 256  }
  0x27   :  { %145 = vsyncadd [#allocation6], 4294967040  ;;  %v43_v0 = vlaneseq  ;;  %v38_v3 = vld [vmem:[#allocation2] sm:$0x1]  ;;  %v152_v4 = vmov 0   ;;  %s153_s7 = smov [#allocation7]  }
  0x28   :  { %vm39_vm0 = vcmp.le.f32.partialorder %v38_v3, 0.5  ;;  %s57_s8 = sshll.u32 %s153_s7, 4  ;;  %v40_v6 = vld [vmem:[#allocation5] sm:$0xff]  ;;  %v41_v8 = vld [vmem:[#allocation5 + $0x8] sm:$0xff]  ;;  %s58_s8 = int_to_ptr.vmem [resolvable:$true] %s57_s8 }
  0x29   :  { %v44_v1 = vshrl.u32 %v43_v0, 7  ;;  %v42_v5 = vsel %vm39_vm0, 1, %v152_v4  ;;  %s120_s1 = scalar_lea.vmem %s58_s8, 256  ;;  %p125_p3 = scmp.lt.s32.totalorder %s58_s8, %s58_s8 }
  0x2a   :  { %p121_p2 = scmp.ne.s32.totalorder %s58_s8, %s120_s1  ;;  %p126_p4 = scmp.lt.s32.totalorder %s120_s1, %s120_s1 }
  0x2b   :  { %v45_v2 = vsub.s32 0, %v44_v1 }
  0x2c   :  { %p127_p5 = por %p126_p4, %p125_p3 }
  0x2d   :  { %v46_v7 = vrot.slane %v42_v5, %v45_v2 }
  0x2e   :  { %p128_p6 = pnand %p127_p5, %p121_p2 }
  0x2f   :  { %vm47_vm1 = vcmp.eq.s32.totalorder %v46_v7, 1 }
  0x30   :  { %v48_v9 = vsel %vm47_vm1, 0.0, %v40_v6  ;;  %v49_v10 = vsel %vm47_vm1, 0.0, %v41_v8 }
  0x31   :  { %50 = vst [vmem:[#allocation7] sm:$0xff] %v48_v9  ;;  %51 = vst [vmem:[#allocation7 + $0x8] sm:$0xff] %v49_v10 }
  0x32   :  { %131 = shalt.err (!%p128_p6)
}
  0x33   :  { %s132_s11 = scalar_lea.hbm %s220_s2, 256 }
  0x34   :  { %p133_p7 = scmp.ne.s32.totalorder %s220_s2, %s132_s11  ;;  %p136_p8 = scmp.lt.u32.totalorder %s132_s11, %s220_s2 }
  0x36   :  { %p138_p9 = pnand %p136_p8, %p133_p7 }
  0x38   :  { %141 = shalt.err (!%p138_p9)
}
  0x39   :  { %63 = dma.vmem_to_hbm [thread:$0]  %s58_s8, 256, %s220_s2, [#allocation4], %s150_s0, %s150_s0, %s151_s4  }
  0x3a   :  { %146 = dma.done.wait [#allocation4], 256  }
  0x3b   :  { %147 = vsyncadd [#allocation4], 4294967040 }
  0x3c   :  { %67 = vsyncpa [#allocation3], 1 }
  0x3d   :  { %68 = vsyncpa [#allocation6], 1 }
  0x3e   :  { %69 = vsyncpa [#allocation4], 1 }

</bundles_post_ra>
